<compile_context>
chip_gen: v5e
topology: v5e:2x2
jax: 0.10.0
libtpu: 0.0.40
codegen_flags: <defaults>
</compile_context>

<pallas_src>
import functools

import jax
import jax.numpy as jnp
from jax import lax
from jax.experimental import pallas as pl
from jax.experimental.pallas import tpu as pltpu


def _self_attn_kernel(x_ref, wq_ref, wk_ref, wv_ref, gamma_ref, o_ref,
                      k_scr, v_scr, *, tq, compute_dtype, approx_recip):
    # x_ref:    (1, C, N)  all pixels of this batch (keys/values/queries/residual)
    # wq_ref:   (C, C)     W_q   (C_out, C_in)
    # wk_ref:   (C, C)     W_k
    # wv_ref:   (C, C)     W_v
    # gamma_ref:(1,) f32   scalar in SMEM
    # o_ref:    (1, C, Tq) channel-major, lane-dense output slab
    # k_scr:    (C, N)     VMEM scratch, per-batch keys
    # v_scr:    (C+1, N)   VMEM scratch, per-batch values + ones row (denominator)
    C = x_ref.shape[1]
    N = x_ref.shape[2]
    qi = pl.program_id(1)

    # --- K/V projection hoisted out of the query-tile loop (once per batch) ---
    @pl.when(qi == 0)
    def _():
        x_full = x_ref[0].astype(compute_dtype)                         # (C, N)
        k = jnp.dot(wk_ref[...].astype(compute_dtype), x_full,
                    preferred_element_type=jnp.float32)                 # (C, N) f32
        v = jnp.dot(wv_ref[...].astype(compute_dtype), x_full,
                    preferred_element_type=jnp.float32)                 # (C, N) f32
        k_scr[...] = k.astype(compute_dtype)
        # Ones row appended to V: the PV matmul then also produces the softmax
        # denominator (sum_j p[i, j]) for free on the MXU, already lane-major.
        v_aug = jnp.concatenate([v, jnp.ones((1, N), jnp.float32)], axis=0)
        v_scr[...] = v_aug.astype(compute_dtype)

    # --- Query slab / residual sliced from the resident x block (no 2nd HBM stream) ---
    start = qi * tq
    if tq % 128 == 0:
        start = pl.multiple_of(start, 128)
    elif tq % 8 == 0:
        start = pl.multiple_of(start, 8)
    x_q_res = x_ref[0, :, pl.ds(start, tq)]                              # (C, Tq) orig dtype
    x_q = x_q_res.astype(compute_dtype)

    q = jnp.dot(wq_ref[...].astype(compute_dtype), x_q,
                preferred_element_type=jnp.float32).astype(compute_dtype)  # (C, Tq)

    # energy[i, j] = sum_c q[c, i] * k[c, j]  (no transposes materialized).
    energy = lax.dot_general(q, k_scr[...], (((0,), (0,)), ((), ())),
                             preferred_element_type=jnp.float32)         # (Tq, N) f32

    # Numerically-stable, *unnormalized* softmax; p stays in compute_dtype so
    # the dominant (Tq, N) slab is half-width on the bf16 path.
    m = jnp.max(energy, axis=-1, keepdims=True)                          # (Tq, 1) f32
    p = jnp.exp((energy - m).astype(compute_dtype))                      # (Tq, N)

    # out_aug[:C] = V @ P^T (unnormalized), out_aug[C] = softmax denominator.
    out_aug = lax.dot_general(v_scr[...], p, (((1,), (1,)), ((), ())),
                              preferred_element_type=jnp.float32)        # (C+1, Tq) f32

    # Deferred normalization on the tiny (C, Tq) result instead of (Tq, N).
    inv = pl.reciprocal(out_aug[C:C + 1, :], approx=approx_recip)        # (1, Tq)
    out = out_aug[:C, :] * inv                                           # (C, Tq) f32

    gamma = gamma_ref[0]
    o_ref[0] = (gamma * out + x_q_res).astype(o_ref.dtype)


def _vmem_capacity_bytes():
    """Per-chip VMEM capacity (128 MiB v5e/v6e, 64 MiB v7x); conservative fallback."""
    try:
        info = pltpu.get_tpu_info()
        for attr in ("vmem_capacity_bytes", "vmem_size_bytes", "vmem_bytes"):
            v = getattr(info, attr, None)
            if v:
                return int(v)
    except Exception:
        pass
    return 64 * 1024 * 1024  # conservative (v7x)


def _pick_tile_q(n, c, compute_itemsize, vmem_limit_bytes):
    """Largest legal query tile (N itself, or a multiple of 128 dividing N)
    whose per-step (Tq, N) slabs fit comfortably in the VMEM budget."""
    c_pad = ((max(c, 1) + 7) // 8) * 8
    # Tq-independent residents: x block (double buffered, input dtype ~4B) +
    # K / V_aug scratch (compute dtype).
    fixed = 2 * c_pad * n * 4 + 2 * (c_pad + 8) * n * compute_itemsize
    budget = vmem_limit_bytes // 2        # headroom: out double buffer, temps
    avail = max(budget - fixed, 1 << 20)
    # energy (f32) + p (compute dtype) + one slab of temporary slack.
    per_row = n * (4 + compute_itemsize + 4)
    cap = max(avail // per_row, 128)
    if n <= cap:
        return n                          # single tile (full-extent block is legal)
    best = 0
    t = 128
    limit = min(cap, n)
    while t <= limit:
        if n % t == 0:
            best = t
        t += 128
    if best > 0:
        return best
    # No 128-multiple divisor fits the budget: smallest legal tile, else full N.
    t = 128
    while t <= n:
        if n % t == 0:
            return t
        t += 128
    return n


@functools.partial(jax.jit, static_argnames=("compute_dtype", "tq"))
def self_attention_block(x_nchw, wq, wk, wv, gamma, *,
                         compute_dtype=jnp.bfloat16, tq=None):
    """x_nchw: (B, C, H, W); wq/wk/wv: (C_out, C_in); gamma: (1,) float32."""
    B, C, H, W = x_nchw.shape
    N = H * W

    vmem_cap = _vmem_capacity_bytes()
    vmem_limit = max(min(vmem_cap * 3 // 4, 112 * 1024 * 1024), 32 * 1024 * 1024)
    itemsize = jnp.dtype(compute_dtype).itemsize
    if tq is None:
        tq = _pick_tile_q(N, C, itemsize, vmem_limit)
    assert N % tq == 0

    # Channel-major flatten is a free reshape (no transpose / HBM round trip).
    x_flat = x_nchw.reshape(B, C, N)
    gamma_s = gamma.reshape((1,)).astype(jnp.float32)

    kernel = functools.partial(
        _self_attn_kernel,
        tq=tq,
        compute_dtype=compute_dtype,
        approx_recip=(compute_dtype != jnp.float32),
    )

    # Advisory cost for XLA scheduling of surrounding ops.
    flops = 4 * B * N * N * C + 6 * B * C * C * N
    cost = pl.CostEstimate(flops=int(flops),
                           transcendentals=int(B * N * N),
                           bytes_accessed=int(2 * B * C * N * 4 + 3 * C * C * 4))

    out_flat = pl.pallas_call(
        kernel,
        out_shape=jax.ShapeDtypeStruct((B, C, N), x_nchw.dtype),
        grid_spec=pltpu.PrefetchScalarGridSpec(
            num_scalar_prefetch=0,
            grid=(B, N // tq),
            in_specs=[
                pl.BlockSpec((1, C, N), lambda b, qi: (b, 0, 0)),     # x (single stream)
                pl.BlockSpec((C, C), lambda b, qi: (0, 0)),           # W_q
                pl.BlockSpec((C, C), lambda b, qi: (0, 0)),           # W_k
                pl.BlockSpec((C, C), lambda b, qi: (0, 0)),           # W_v
                pl.BlockSpec(memory_space=pltpu.MemorySpace.SMEM),    # gamma scalar
            ],
            out_specs=pl.BlockSpec((1, C, tq), lambda b, qi: (b, 0, qi)),
            scratch_shapes=[
                pltpu.VMEM((C, N), compute_dtype),       # K (per-batch, hoisted)
                pltpu.VMEM((C + 1, N), compute_dtype),   # V + ones row (denominator)
            ],
        ),
        compiler_params=pltpu.CompilerParams(
            # qi must be sequential per core (per-batch K/V scratch init at qi==0).
            dimension_semantics=("parallel", "arbitrary"),
            vmem_limit_bytes=int(vmem_limit),
        ),
        cost_estimate=cost,
    )(x_flat, wq, wk, wv, gamma_s)

    return out_flat.reshape(B, C, H, W)


def _reference(x_nchw, wq, wk, wv, gamma):
    """Pure-JAX reference mirroring the PyTorch forward (NCHW)."""
    B, C, H, W = x_nchw.shape
    N = H * W
    xf = x_nchw.reshape(B, C, N)                      # (B, C, N)
    q = jnp.einsum("oc,bcn->bon", wq, xf)             # conv1x1
    k = jnp.einsum("oc,bcn->bon", wk, xf)
    v = jnp.einsum("oc,bcn->bon", wv, xf)
    qp = jnp.transpose(q, (0, 2, 1))                  # (B, N, C)
    energy = jnp.einsum("bnc,bcm->bnm", qp, k)        # (B, N, N)
    attention = jax.nn.softmax(energy, axis=-1)
    out = jnp.einsum("bcm,bnm->bcn", v, attention)    # (B, C, N)
    out = out.reshape(B, C, H, W)
    return gamma.reshape(()) * out + x_nchw


def _make_params(key, B, C, H, W):
    kx, kq, kk, kv = jax.random.split(key, 4)
    x = jax.random.normal(kx, (B, C, H, W), dtype=jnp.float32)
    bound = 1.0 / (C ** 0.5)
    wq = jax.random.uniform(kq, (C, C), jnp.float32, -bound, bound)
    wk = jax.random.uniform(kk, (C, C), jnp.float32, -bound, bound)
    wv = jax.random.uniform(kv, (C, C), jnp.float32, -bound, bound)
    gamma = jnp.full((1,), 0.1, dtype=jnp.float32)
    return x, wq, wk, wv, gamma


def _check(x, wq, wk, wv, gamma, compute_dtype, atol, rtol, tq=None):
    out = self_attention_block(x, wq, wk, wv, gamma,
                               compute_dtype=compute_dtype, tq=tq)
    out = jax.block_until_ready(out)
    ref = _reference(x, wq, wk, wv, gamma)
    assert out.shape == x.shape
    assert jnp.allclose(out, ref, atol=atol, rtol=rtol), (
        f"max |err| = {jnp.max(jnp.abs(out - ref))} "
        f"for dtype {compute_dtype}, tq={tq}")


if __name__ == "__main__":
    root = jax.random.PRNGKey(0)
    key_a, key_b = jax.random.split(root, 2)

    # Primary spec shape: (B, C, H, W) = (2, 4, 16, 16) -> N = 256.
    x, wq, wk, wv, gamma = _make_params(key_a, 2, 4, 16, 16)
    _check(x, wq, wk, wv, gamma, jnp.float32, atol=5e-4, rtol=5e-4)   # exact path
    _check(x, wq, wk, wv, gamma, jnp.bfloat16, atol=2e-2, rtol=2e-2)  # fast bf16 path
    # Forced small query tile: exercises the multi-tile grid, the in-kernel
    # query-slab slicing and the per-batch K/V recompute (@pl.when(qi == 0)).
    _check(x, wq, wk, wv, gamma, jnp.float32, atol=5e-4, rtol=5e-4, tq=128)

    # Second shape: (1, 8, 32, 32) -> N = 1024.
    x2, wq2, wk2, wv2, gamma2 = _make_params(key_b, 1, 8, 32, 32)
    _check(x2, wq2, wk2, wv2, gamma2, jnp.float32, atol=1e-3, rtol=1e-3)
    _check(x2, wq2, wk2, wv2, gamma2, jnp.bfloat16, atol=2e-2, rtol=2e-2)
    _check(x2, wq2, wk2, wv2, gamma2, jnp.bfloat16, atol=2e-2, rtol=2e-2, tq=256)

    print("KERNEL_OK")
</pallas_src>

<mosaic_0001>
module attributes {stable_mosaic.version = 11 : i64} {
  func.func @_self_attn_kernel(%arg0: i32, %arg1: i32, %arg2: memref<1x4x256xf32, #tpu.memory_space<vmem>>, %arg3: memref<4x4xf32, #tpu.memory_space<vmem>>, %arg4: memref<4x4xf32, #tpu.memory_space<vmem>>, %arg5: memref<4x4xf32, #tpu.memory_space<vmem>>, %arg6: memref<1xf32, #tpu.memory_space<smem>>, %arg7: memref<1x4x256xf32, #tpu.memory_space<vmem>>, %arg8: memref<4x256xf32, #tpu.memory_space<vmem>>, %arg9: memref<5x256xf32, #tpu.memory_space<vmem>>) attributes {dimension_semantics = [#tpu.dimension_semantics<parallel>, #tpu.dimension_semantics<arbitrary>], iteration_bounds = array<i64: 2, 1>, scalar_prefetch = 0 : i64, scratch_operands = 2 : i64, tpu.core_type = #tpu.core_type<tc>, window_params = [{transform_indices = @transform_0, window_bounds = array<i64: 1, 4, 256>}, {pipeline_mode = #tpu.pipeline_mode<synchronous>, transform_indices = @transform_1, window_bounds = array<i64: 4, 4>}, {pipeline_mode = #tpu.pipeline_mode<synchronous>, transform_indices = @transform_2, window_bounds = array<i64: 4, 4>}, {pipeline_mode = #tpu.pipeline_mode<synchronous>, transform_indices = @transform_3, window_bounds = array<i64: 4, 4>}, {transform_indices = @transform_4, window_bounds = array<i64: 1>}, {transform_indices = @transform_5, window_bounds = array<i64: 1, 4, 256>}]} {
    %c0_i32 = arith.constant 0 : i32
    %0 = arith.cmpi eq, %arg1, %c0_i32 : i32
    %1 = arith.extui %0 : i1 to i32
    %c0_i32_0 = arith.constant 0 : i32
    %2 = arith.cmpi ne, %1, %c0_i32_0 : i32
    scf.if %2 {
      %c0_15 = arith.constant 0 : index
      %c0_16 = arith.constant 0 : index
      %c0_17 = arith.constant 0 : index
      %31 = vector.load %arg2[%c0_15, %c0_16, %c0_17] : memref<1x4x256xf32, #tpu.memory_space<vmem>>, vector<1x4x256xf32>
      %32 = vector.shape_cast %31 : vector<1x4x256xf32> to vector<4x256xf32>
      %c0_18 = arith.constant 0 : index
      %c0_19 = arith.constant 0 : index
      %33 = vector.load %arg4[%c0_18, %c0_19] : memref<4x4xf32, #tpu.memory_space<vmem>>, vector<4x4xf32>
      %cst_20 = arith.constant dense<0.000000e+00> : vector<4x256xf32>
      %34 = tpu.matmul %33, %32, %cst_20 {dimension_numbers = #tpu.dot_dimension_numbers<[1], [0], [0], [1], [0, 0, 1, 1], [], []>} : vector<4x4xf32>, vector<4x256xf32>, vector<4x256xf32> -> vector<4x256xf32>
      %c0_21 = arith.constant 0 : index
      %c0_22 = arith.constant 0 : index
      %35 = vector.load %arg5[%c0_21, %c0_22] : memref<4x4xf32, #tpu.memory_space<vmem>>, vector<4x4xf32>
      %cst_23 = arith.constant dense<0.000000e+00> : vector<4x256xf32>
      %36 = tpu.matmul %35, %32, %cst_23 {dimension_numbers = #tpu.dot_dimension_numbers<[1], [0], [0], [1], [0, 0, 1, 1], [], []>} : vector<4x4xf32>, vector<4x256xf32>, vector<4x256xf32> -> vector<4x256xf32>
      %c0_24 = arith.constant 0 : index
      %c0_25 = arith.constant 0 : index
      %37 = vector.load %arg8[%c0_24, %c0_25] : memref<4x256xf32, #tpu.memory_space<vmem>>, vector<4x256xf32>
      tpu.vector_store %arg8[%c0_24, %c0_25], %34 {strides = array<i32>} : memref<4x256xf32, #tpu.memory_space<vmem>>, vector<4x256xf32>,
      %cst_26 = arith.constant 1.000000e+00 : f32
      %38 = vector.broadcast %cst_26 : f32 to vector<1x256xf32>
      %39 = tpu.concatenate %36, %38 in 0 : vector<4x256xf32>, vector<1x256xf32> -> vector<5x256xf32>
      %c0_27 = arith.constant 0 : index
      %c0_28 = arith.constant 0 : index
      %40 = vector.load %arg9[%c0_27, %c0_28] : memref<5x256xf32, #tpu.memory_space<vmem>>, vector<5x256xf32>
      tpu.vector_store %arg9[%c0_27, %c0_28], %39 {strides = array<i32>} : memref<5x256xf32, #tpu.memory_space<vmem>>, vector<5x256xf32>,
    } else {
    }
    %c256_i32 = arith.constant 256 : i32
    %3 = arith.muli %arg1, %c256_i32 : i32
    %4 = tpu.assume_multiple %3, 128 : i32
    %c0 = arith.constant 0 : index
    %c0_1 = arith.constant 0 : index
    %5 = arith.index_cast %4 : i32 to index
    %6 = vector.load %arg2[%c0, %c0_1, %5] : memref<1x4x256xf32, #tpu.memory_space<vmem>>, vector<1x4x256xf32>
    %7 = vector.shape_cast %6 : vector<1x4x256xf32> to vector<4x256xf32>
    %c0_2 = arith.constant 0 : index
    %c0_3 = arith.constant 0 : index
    %8 = vector.load %arg3[%c0_2, %c0_3] : memref<4x4xf32, #tpu.memory_space<vmem>>, vector<4x4xf32>
    %cst = arith.constant dense<0.000000e+00> : vector<4x256xf32>
    %9 = tpu.matmul %8, %7, %cst {dimension_numbers = #tpu.dot_dimension_numbers<[1], [0], [0], [1], [0, 0, 1, 1], [], []>} : vector<4x4xf32>, vector<4x256xf32>, vector<4x256xf32> -> vector<4x256xf32>
    %c0_4 = arith.constant 0 : index
    %c0_5 = arith.constant 0 : index
    %10 = vector.load %arg8[%c0_4, %c0_5] : memref<4x256xf32, #tpu.memory_space<vmem>>, vector<4x256xf32>
    %cst_6 = arith.constant dense<0.000000e+00> : vector<256x256xf32>
    %11 = tpu.matmul %9, %10, %cst_6 {dimension_numbers = #tpu.dot_dimension_numbers<[0], [0], [1], [1], [0, 1, 1, 1], [], []>} : vector<4x256xf32>, vector<4x256xf32>, vector<256x256xf32> -> vector<256x256xf32>
    %cst_7 = arith.constant dense<0xFF800000> : vector<256xf32>
    %12 = vector.multi_reduction <maximumf>, %11, %cst_7 [1] : vector<256x256xf32> to vector<256xf32>
    %13 = vector.shape_cast %12 : vector<256xf32> to vector<256x1xf32>
    %14 = vector.broadcast %13 : vector<256x1xf32> to vector<256x256xf32>
    %15 = arith.subf %11, %14 : vector<256x256xf32>
    %16 = math.exp %15 : vector<256x256xf32>
    %c0_8 = arith.constant 0 : index
    %c0_9 = arith.constant 0 : index
    %17 = vector.load %arg9[%c0_8, %c0_9] : memref<5x256xf32, #tpu.memory_space<vmem>>, vector<5x256xf32>
    %cst_10 = arith.constant dense<0.000000e+00> : vector<5x256xf32>
    %18 = tpu.matmul %17, %16, %cst_10 {dimension_numbers = #tpu.dot_dimension_numbers<[1], [1], [0], [0], [0, 0, 1, 0], [], []>} : vector<5x256xf32>, vector<256x256xf32>, vector<5x256xf32> -> vector<5x256xf32>
    %19 = vector.extract_strided_slice %18 {offsets = [4, 0], sizes = [1, 256], strides = [1, 1]} : vector<5x256xf32> to vector<1x256xf32>
    %20 = tpu.reciprocal %19 : vector<1x256xf32> -> vector<1x256xf32>
    %21 = vector.extract_strided_slice %18 {offsets = [0, 0], sizes = [4, 256], strides = [1, 1]} : vector<5x256xf32> to vector<4x256xf32>
    %22 = vector.broadcast %20 : vector<1x256xf32> to vector<4x256xf32>
    %23 = arith.mulf %21, %22 : vector<4x256xf32>
    %c0_11 = arith.constant 0 : index
    %24 = memref.load %arg6[%c0_11] : memref<1xf32, #tpu.memory_space<smem>>
    %25 = vector.broadcast %24 : f32 to vector<4x256xf32>
    %26 = arith.mulf %25, %23 : vector<4x256xf32>
    %27 = arith.addf %26, %7 : vector<4x256xf32>
    %c0_12 = arith.constant 0 : index
    %c0_13 = arith.constant 0 : index
    %c0_14 = arith.constant 0 : index
    %28 = vector.load %arg7[%c0_12, %c0_13, %c0_14] : memref<1x4x256xf32, #tpu.memory_space<vmem>>, vector<1x4x256xf32>
    %29 = vector.shape_cast %28 : vector<1x4x256xf32> to vector<4x256xf32>
    %30 = vector.shape_cast %27 : vector<4x256xf32> to vector<1x4x256xf32>
    tpu.vector_store %arg7[%c0_12, %c0_13, %c0_14], %30 {strides = array<i32>} : memref<1x4x256xf32, #tpu.memory_space<vmem>>, vector<1x4x256xf32>,
    return
  }
  func.func @transform_0(%arg0: i32, %arg1: i32) -> (i32, i32, i32) {
    %c0_i32 = arith.constant 0 : i32
    %c0_i32_0 = arith.constant 0 : i32
    %c0_i32_1 = arith.constant 0 : i32
    return %arg0, %c0_i32, %c0_i32_0 : i32, i32, i32
  }
  func.func @transform_1(%arg0: i32, %arg1: i32) -> (i32, i32) {
    %c0_i32 = arith.constant 0 : i32
    %c0_i32_0 = arith.constant 0 : i32
    %c0_i32_1 = arith.constant 0 : i32
    return %c0_i32, %c0_i32_0 : i32, i32
  }
  func.func @transform_2(%arg0: i32, %arg1: i32) -> (i32, i32) {
    %c0_i32 = arith.constant 0 : i32
    %c0_i32_0 = arith.constant 0 : i32
    %c0_i32_1 = arith.constant 0 : i32
    return %c0_i32, %c0_i32_0 : i32, i32
  }
  func.func @transform_3(%arg0: i32, %arg1: i32) -> (i32, i32) {
    %c0_i32 = arith.constant 0 : i32
    %c0_i32_0 = arith.constant 0 : i32
    %c0_i32_1 = arith.constant 0 : i32
    return %c0_i32, %c0_i32_0 : i32, i32
  }
  func.func @transform_4(%arg0: i32, %arg1: i32) -> i32 {
    %c0_i32 = arith.constant 0 : i32
    %c0_i32_0 = arith.constant 0 : i32
    return %c0_i32 : i32
  }
  func.func @transform_5(%arg0: i32, %arg1: i32) -> (i32, i32, i32) {
    %c0_i32 = arith.constant 0 : i32
    %c0_i32_0 = arith.constant 0 : i32
    return %arg0, %c0_i32, %arg1 : i32, i32, i32
  }
}

</mosaic_0001>

<bundles_post_ra>
// kernel: self_attention_block.1
= control target key start
LH: loop header
LB: loop body
LE: loop exit
PB: predicated region body
PF: predicated region fallthrough
CT: control target
= control target key end

     0   :  { %s1633_s20 = smov 0   ;;  %s1635_s21 = smov 0   ;;  %s2066_s0 = inlined_call_operand.vmem [shape: f32[2,4,256], index: 0, kind: input, shape index: {}]   ;;  %s2067_s1 = inlined_call_operand.vmem [shape: f32[4,4], index: 1, kind: input, shape index: {}]   ;;  %s2068_s2 = inlined_call_operand.vmem [shape: f32[4,4], index: 2, kind: input, shape index: {}]   ;;  %s2069_s3 = inlined_call_operand.vmem [shape: f32[4,4], index: 3, kind: input, shape index: {}]   ;;  %s2070_s4 = inlined_call_operand.<no memory space> [shape: f32[1], index: 4, kind: input, shape index: {}]   ;;  %s2071_s5 = inlined_call_operand.vmem [shape: f32[2,4,256], index: 5, kind: output, shape index: {}]  }
   0x1   :  { %10 = sst [smem:[#allocation4]] %s2070_s4  ;;  %s1637_s22 = smov 0  }
   0x2 LB: > { %s28_s4 = sadd.s32 1, %s1594_s21  ;;  %p1330_p0 = scmp.ge.s32.totalorder %s1598_s22, 1  ;;  %s1598_s22 = sphi %s1637_s22, %s16_s22   ;;  %s1594_s21 = sphi %s1635_s21, %s2121_s21   ;;  %s1590_s20 = sphi %s1633_s20, %s2120_s20  }
   0x3   : > { %p30_p1 = scmp.ge.s32.totalorder %s28_s4, 2  ;;  %p202_p2 = scmp.lt.s32.totalorder %s1598_s22, 3 }
   0x5   : > { %s2123_s4 = smov (%p30_p1, %s28_s4), 0  ;;  %p203_p3 = pnand %p1330_p0, %p202_p2 }
   0x7   : > { %206 = sbr.rel (%p203_p3) target bundleno = 1069 (0x42d), region = 40 }
   0xc   : > { %p234_p4 = scmp.lt.s32.totalorder %s1590_s20, 1  ;;  %vm263_vm0 = vcmask 1043456   ;;  %v254_v1 = vld [vmem:[%s2068_s2] sm:$0xf]  ;;  %vm259_vm1 = vcmask 31744   ;;  %s1226_s8 = sld [smem:[#allocation4]] }
   0xd   : > { %v308_v4 = vld [vmem:[%s2069_s3] sm:$0xf] }
   0xe   : > { %s2125_s20 = smov (!%p234_p4, %s1590_s20), 1  ;;  %v375_v7 = vld [vmem:[%s2067_s1] sm:$0xf] }
   0xf   : > { %s1415_s23 = sshll.u32 %s2125_s20, 3 }
  0x10   : > { %s238_s26 = scalar_lea.vmem %s2066_s0, %s1415_s23  ;;  %s247_s11 = scalar_lea.vmem %s2071_s5, %s1415_s23 }
  0x11   : > { %v253_v0 = vld [vmem:[%s238_s26] sm:$0xff] }
  0x12   : > { %256 = vst [vmem:[#allocation1] ss:$2 sm:$0xff] %v253_v0 }
  0x19   : > { %v257_v2 = vld.sshfl [vmem:[#allocation1] sm:$0xff pattern:$0x75316420]  ;;  %v258_v3 = vld.sshfl [vmem:[#allocation1 + $0x8] sm:$0xff pattern:$0x75316420] }
  0x1a   : > { %1335 = vmatpush.msk.msra.mxu0 %vm263_vm0, %v257_v2  ;;  %1337 = vmatpush.msk.msra.mxu1 %vm263_vm0, %v258_v3  ;;  %309 = vst [vmem:[#allocation1] ss:$2 sm:$0xff] %v253_v0 }
  0x1b   : > { %1336 = vmatmul.msk.f32.vlgmr.msra.gmra.mxu0 %vm259_vm1, %v254_v1  ;;  %1338 = vmatmul.msk.f32.vlgmr.msra.gmra.mxu1 %vm259_vm1, %v254_v1 }
  0x21   : > { %v310_v5 = vld.sshfl [vmem:[#allocation1] sm:$0xff pattern:$0x75316420]  ;;  %v311_v6 = vld.sshfl [vmem:[#allocation1 + $0x8] sm:$0xff pattern:$0x75316420] }
  0x22   : > { %1339 = vmatpush.msk.msrb.mxu0 %vm263_vm0, %v310_v5  ;;  %377 = vst [vmem:[#allocation1] ss:$2 sm:$0xff] %v253_v0  ;;  %1341 = vmatpush.msk.msra.mxu3 %vm263_vm0, %v311_v6 }
  0x23   : > { %1340 = vmatmul.msk.f32.vlgmr.msrb.gmra.mxu0 %vm259_vm1, %v308_v4  ;;  %1342 = vmatmul.msk.f32.vlgmr.msra.gmra.mxu3 %vm259_vm1, %v308_v4 }
  0x29   : > { %v378_v8 = vld.sshfl [vmem:[#allocation1] sm:$0xff pattern:$0x75316420]  ;;  %v379_v9 = vld.sshfl [vmem:[#allocation1 + $0x8] sm:$0xff pattern:$0x75316420] }
  0x2a   : > { %1343 = vmatpush.msk.msra.mxu0 %vm263_vm0, %v378_v8  ;;  %1345 = vmatpush.msk.msrb.mxu1 %vm263_vm0, %v379_v9 }
  0x2b   : > { %1344 = vmatmul.msk.f32.vlgmr.msra.gmra.mxu0 %vm259_vm1, %v375_v7  ;;  %1346 = vmatmul.msk.f32.vlgmr.msrb.gmra.mxu1 %vm259_vm1, %v375_v7 }
  0x98   : > { %v285_v10 = vpop.f32.mrf.mxu0  ;;  %v305_v11 = vpop.f32.mrf.mxu1 }
  0x99   : > { %v361_v12 = vrot.slane %v305_v11, 4 }
  0x9b   : > { %v362_v13 = vsel %vm263_vm0, %v285_v10, %v361_v12 }
  0x9c   : > { %495 = vst [vmem:[#allocation1] ss:$2 sm:$0xff] %v362_v13 }
  0xa0   : > { %v336_v14 = vpop.f32.mrf.mxu0 }
  0xa1   : > { %v365_v15 = vsel %vm263_vm0, %v336_v14, 1.0 }
  0xa2   : > { %367 = vst [vmem:[#allocation3] sm:$0x1f] %v365_v15 }
  0xa3   : > { %v496_v16 = vld.sshfl [vmem:[#allocation1] sm:$0xff pattern:$0x75316420]  ;;  %v497_v17 = vld.sshfl [vmem:[#allocation1 + $0x8] sm:$0xff pattern:$0x75316420] }
  0xa4   : > { %1347 = vmatpush.msk.msrb.mxu0 %vm263_vm0, %v496_v16  ;;  %1417 = vmatpush.msk.msra.mxu2 %vm263_vm0, %v496_v16  ;;  %1230 = vst [vmem:[#allocation1] ss:$2 sm:$0xff] %v253_v0 }
  0xa5   : > { %1380 = vmatpush.msk.msra.mxu1 %vm263_vm0, %v497_v17  ;;  %1418 = vmatpush.msk.msrb.mxu3 %vm263_vm0, %v497_v17 }
  0xa6   : > { %v356_v57 = vpop.f32.mrf.mxu3 }
  0xa7   : > { %v366_v58 = vsel %vm263_vm0, %v356_v57, 1.0 }
  0xa8   : > { %v406_v18 = vpop.f32.mrf.mxu0  ;;  %v426_v19 = vpop.f32.mrf.mxu1  ;;  %368 = vst [vmem:[#allocation3 + $0x8] sm:$0x1f] %v366_v58 }
  0xa9   : > { %430 = vxpose.xlu0.b32.start.end [1/1] (short) %v406_v18, 128 }
 0x129   : > { %462 = vxpose.xlu0.b32.start.end [1/1] (short) %v426_v19, 128 }
 0x14d   : > { %v446_v20 = vpop.trf.xlu0 }
 0x14e   : > { %1348 = vmatmul.msk.f32.vlgmr.msrb.gmra.mxu0 %vm259_vm1, %v446_v20  ;;  %1381 = vmatmul.msk.f32.vlgmr.msra.gmra.mxu1 %vm259_vm1, %v446_v20 }
 0x155   : > { %v447_v21 = vpop.trf.xlu0 }
 0x156   : > { %1349 = vmatmul.msk.f32.gmra.mxu0 %vm259_vm1, %v447_v21  ;;  %1382 = vmatmul.msk.f32.gmra.mxu1 %vm259_vm1, %v447_v21 }
 0x15d   : > { %v448_v22 = vpop.trf.xlu0 }
 0x15e   : > { %1350 = vmatmul.msk.f32.gmra.mxu0 %vm259_vm1, %v448_v22  ;;  %1383 = vmatmul.msk.f32.gmra.mxu1 %vm259_vm1, %v448_v22 }
 0x165   : > { %v449_v23 = vpop.trf.xlu0 }
 0x166   : > { %1351 = vmatmul.msk.f32.gmra.mxu0 %vm259_vm1, %v449_v23  ;;  %1384 = vmatmul.msk.f32.gmra.mxu1 %vm259_vm1, %v449_v23 }
 0x16d   : > { %v450_v24 = vpop.trf.xlu0 }
 0x16e   : > { %1352 = vmatmul.msk.f32.gmra.mxu0 %vm259_vm1, %v450_v24  ;;  %1385 = vmatmul.msk.f32.gmra.mxu1 %vm259_vm1, %v450_v24 }
 0x175   : > { %v451_v25 = vpop.trf.xlu0 }
 0x176   : > { %1353 = vmatmul.msk.f32.gmra.mxu0 %vm259_vm1, %v451_v25  ;;  %1386 = vmatmul.msk.f32.gmra.mxu1 %vm259_vm1, %v451_v25 }
 0x17d   : > { %v452_v26 = vpop.trf.xlu0 }
 0x17e   : > { %1354 = vmatmul.msk.f32.gmra.mxu0 %vm259_vm1, %v452_v26  ;;  %1387 = vmatmul.msk.f32.gmra.mxu1 %vm259_vm1, %v452_v26 }
 0x185   : > { %v453_v27 = vpop.trf.xlu0 }
 0x186   : > { %1355 = vmatmul.msk.f32.gmra.mxu0 %vm259_vm1, %v453_v27  ;;  %1388 = vmatmul.msk.f32.gmra.mxu1 %vm259_vm1, %v453_v27 }
 0x18d   : > { %v454_v28 = vpop.trf.xlu0 }
 0x18e   : > { %1356 = vmatmul.msk.f32.gmra.mxu0 %vm259_vm1, %v454_v28  ;;  %1389 = vmatmul.msk.f32.gmra.mxu1 %vm259_vm1, %v454_v28 }
 0x195   : > { %v455_v29 = vpop.trf.xlu0 }
 0x196   : > { %1357 = vmatmul.msk.f32.vlgmr.msra.gmra.mxu2 %vm259_vm1, %v455_v29  ;;  %1390 = vmatmul.msk.f32.gmra.mxu1 %vm259_vm1, %v455_v29 }
 0x19d   : > { %v456_v30 = vpop.trf.xlu0 }
 0x19e   : > { %1358 = vmatmul.msk.f32.gmra.mxu2 %vm259_vm1, %v456_v30  ;;  %1391 = vmatmul.msk.f32.gmra.mxu1 %vm259_vm1, %v456_v30 }
 0x1a5   : > { %v457_v31 = vpop.trf.xlu0 }
 0x1a6   : > { %1359 = vmatmul.msk.f32.gmra.mxu2 %vm259_vm1, %v457_v31  ;;  %1392 = vmatmul.msk.f32.vlgmr.msrb.gmra.mxu3 %vm259_vm1, %v457_v31 }
 0x1ad   : > { %v458_v32 = vpop.trf.xlu0 }
 0x1ae   : > { %1360 = vmatmul.msk.f32.gmra.mxu2 %vm259_vm1, %v458_v32  ;;  %1393 = vmatmul.msk.f32.gmra.mxu3 %vm259_vm1, %v458_v32 }
 0x1b5   : > { %v459_v33 = vpop.trf.xlu0 }
 0x1b6   : > { %1361 = vmatmul.msk.f32.gmra.mxu2 %vm259_vm1, %v459_v33  ;;  %1394 = vmatmul.msk.f32.gmra.mxu3 %vm259_vm1, %v459_v33 }
 0x1bd   : > { %v460_v34 = vpop.trf.xlu0 }
 0x1be   : > { %1362 = vmatmul.msk.f32.gmra.mxu2 %vm259_vm1, %v460_v34  ;;  %1395 = vmatmul.msk.f32.gmra.mxu3 %vm259_vm1, %v460_v34 }
 0x1c5   : > { %v461_v35 = vpop.trf.xlu0 }
 0x1c6   : > { %1363 = vmatmul.msk.f32.gmra.mxu2 %vm259_vm1, %v461_v35  ;;  %1396 = vmatmul.msk.f32.gmra.mxu3 %vm259_vm1, %v461_v35 }
 0x1cb   : > { %v1718_v36 = vpop.f32.mrf.mxu0  ;;  %v1720_v37 = vpop.f32.mrf.mxu1 }
 0x1cd   : > { %v478_v38 = vpop.trf.xlu0 }
 0x1ce   : > { %1364 = vmatmul.msk.f32.gmra.mxu2 %vm259_vm1, %v478_v38  ;;  %1397 = vmatmul.msk.f32.gmra.mxu3 %vm259_vm1, %v478_v38 }
 0x1d3   : > { %v1724_v39 = vpop.f32.mrf.mxu0  ;;  %v1726_v40 = vpop.f32.mrf.mxu1 }
 0x1d5   : > { %v479_v41 = vpop.trf.xlu0 }
 0x1d6   : > { %1365 = vmatmul.msk.f32.gmra.mxu2 %vm259_vm1, %v479_v41  ;;  %1398 = vmatmul.msk.f32.gmra.mxu3 %vm259_vm1, %v479_v41 }
 0x1db   : > { %v1730_v42 = vpop.f32.mrf.mxu0  ;;  %v1732_v43 = vpop.f32.mrf.mxu1 }
 0x1dd   : > { %v480_v44 = vpop.trf.xlu0 }
 0x1de   : > { %1366 = vmatmul.msk.f32.gmra.mxu2 %vm259_vm1, %v480_v44  ;;  %1399 = vmatmul.msk.f32.gmra.mxu3 %vm259_vm1, %v480_v44 }
 0x1e3   : > { %v1736_v45 = vpop.f32.mrf.mxu0  ;;  %v1738_v46 = vpop.f32.mrf.mxu1 }
 0x1e5   : > { %v481_v47 = vpop.trf.xlu0 }
 0x1e6   : > { %1367 = vmatmul.msk.f32.gmra.mxu2 %vm259_vm1, %v481_v47  ;;  %1400 = vmatmul.msk.f32.gmra.mxu3 %vm259_vm1, %v481_v47 }
 0x1eb   : > { %v1742_v48 = vpop.f32.mrf.mxu0  ;;  %v1744_v49 = vpop.f32.mrf.mxu1 }
 0x1ec   : > { %v836_v47 = vmax.f32 %v1742_v48, %v1744_v49 }
 0x1ed   : > { %v482_v50 = vpop.trf.xlu0 }
 0x1ee   : > { %1368 = vmatmul.msk.f32.gmra.mxu2 %vm259_vm1, %v482_v50  ;;  %1401 = vmatmul.msk.f32.gmra.mxu3 %vm259_vm1, %v482_v50 }
 0x1f3   : > { %v1748_v51 = vpop.f32.mrf.mxu0  ;;  %v1750_v52 = vpop.f32.mrf.mxu1 }
 0x1f4   : > { %v839_v38 = vmax.f32 %v1748_v51, %v1750_v52 }
 0x1f5   : > { %v483_v53 = vpop.trf.xlu0 }
 0x1f6   : > { %1369 = vmatmul.msk.f32.gmra.mxu2 %vm259_vm1, %v483_v53  ;;  %1402 = vmatmul.msk.f32.gmra.mxu3 %vm259_vm1, %v483_v53 }
 0x1fb   : > { %v1754_v54 = vpop.f32.mrf.mxu0  ;;  %v1756_v55 = vpop.f32.mrf.mxu1 }
 0x1fc   : > { %v842_v33 = vmax.f32 %v1754_v54, %v1756_v55 }
 0x1fd   : > { %v484_v56 = vpop.trf.xlu0 }
 0x1fe   : > { %1370 = vmatmul.msk.f32.gmra.mxu2 %vm259_vm1, %v484_v56  ;;  %1403 = vmatmul.msk.f32.gmra.mxu3 %vm259_vm1, %v484_v56  ;;  %v833_v56 = vmax.f32 %v1736_v45, %v1738_v46 }
 0x203   : > { %v1761_v59 = vpop.f32.mrf.mxu0  ;;  %v1763_v60 = vpop.f32.mrf.mxu1 }
 0x204   : > { %v845_v61 = vmax.f32 %v1761_v59, %v1763_v60 }
 0x205   : > { %v485_v62 = vpop.trf.xlu0 }
 0x206   : > { %846 = vmax.xlane.f32.xlu1 %v845_v61  ;;  %1371 = vmatmul.msk.f32.gmra.mxu2 %vm259_vm1, %v485_v62  ;;  %v830_v61 = vmax.f32 %v1730_v42, %v1732_v43 }
 0x207   : > { %1404 = vmatmul.msk.f32.gmra.mxu3 %vm259_vm1, %v485_v62 }
 0x20b   : > { %v1769_v63 = vpop.f32.mrf.mxu0  ;;  %v1771_v0 = vpop.f32.mrf.mxu1 }
 0x20c   : > { %v848_v1 = vmax.f32 %v1769_v63, %v1771_v0 }
 0x20d   : > { %v486_v2 = vpop.trf.xlu0 }
 0x20e   : > { %849 = vmax.xlane.f32.xlu1 %v848_v1  ;;  %1372 = vmatmul.msk.f32.gmra.mxu2 %vm259_vm1, %v486_v2 }
 0x20f   : > { %1405 = vmatmul.msk.f32.gmra.mxu3 %vm259_vm1, %v486_v2  ;;  %v827_v2 = vmax.f32 %v1724_v39, %v1726_v40 }
 0x213   : > { %v1779_v4 = vpop.f32.mrf.mxu1 }
 0x215   : > { %v487_v3 = vpop.trf.xlu0 }
 0x216   : > { %1373 = vmatmul.msk.f32.gmra.mxu2 %vm259_vm1, %v487_v3 }
 0x217   : > { %1406 = vmatmul.msk.f32.gmra.mxu3 %vm259_vm1, %v487_v3 }
 0x219   : > { %v1781_v5 = vpop.f32.mrf.mxu2 }
 0x21a   : > { %v851_v6 = vmax.f32 %v1781_v5, %v1779_v4 }
 0x21b   : > { %v1789_v9 = vpop.f32.mrf.mxu1 }
 0x21c   : > { %852 = vmax.xlane.f32.xlu1 %v851_v6 }
 0x21d   : > { %v488_v7 = vpop.trf.xlu0 }
 0x21e   : > { %1374 = vmatmul.msk.f32.gmra.mxu2 %vm259_vm1, %v488_v7 }
 0x21f   : > { %1407 = vmatmul.msk.f32.gmra.mxu3 %vm259_vm1, %v488_v7 }
 0x221   : > { %v1787_v8 = vpop.f32.mrf.mxu2 }
 0x222   : > { %v854_v10 = vmax.f32 %v1787_v8, %v1789_v9 }
 0x224   : > { %855 = vmax.xlane.f32.xlu1 %v854_v10  ;;  %v824_v10 = vmax.f32 %v1718_v36, %v1720_v37 }
 0x225   : > { %v489_v11 = vpop.trf.xlu0 }
 0x226   : > { %1375 = vmatmul.msk.f32.gmra.mxu2 %vm259_vm1, %v489_v11 }
 0x227   : > { %1408 = vmatmul.msk.f32.gmra.mxu3 %vm259_vm1, %v489_v11 }
 0x229   : > { %v1795_v12 = vpop.f32.mrf.mxu2  ;;  %v1797_v13 = vpop.f32.mrf.mxu3 }
 0x22a   : > { %v857_v14 = vmax.f32 %v1795_v12, %v1797_v13 }
 0x22c   : > { %858 = vmax.xlane.f32.xlu1 %v857_v14 }
 0x22d   : > { %v490_v15 = vpop.trf.xlu0 }
 0x22e   : > { %1376 = vmatmul.msk.f32.gmra.mxu2 %vm259_vm1, %v490_v15 }
 0x22f   : > { %1409 = vmatmul.msk.f32.gmra.mxu3 %vm259_vm1, %v490_v15 }
 0x231   : > { %v1803_v16 = vpop.f32.mrf.mxu2  ;;  %v1805_v17 = vpop.f32.mrf.mxu3 }
 0x232   : > { %v860_v18 = vmax.f32 %v1803_v16, %v1805_v17 }
 0x234   : > { %861 = vmax.xlane.f32.xlu1 %v860_v18 }
 0x235   : > { %v491_v19 = vpop.trf.xlu0 }
 0x236   : > { %1377 = vmatmul.msk.f32.gmra.mxu2 %vm259_vm1, %v491_v19 }
 0x237   : > { %1410 = vmatmul.msk.f32.gmra.mxu3 %vm259_vm1, %v491_v19 }
 0x239   : > { %v1811_v20 = vpop.f32.mrf.mxu2  ;;  %v1813_v21 = vpop.f32.mrf.mxu3 }
 0x23a   : > { %v863_v22 = vmax.f32 %v1811_v20, %v1813_v21 }
 0x23c   : > { %864 = vmax.xlane.f32.xlu2 %v863_v22 }
 0x23d   : > { %v492_v23 = vpop.trf.xlu0 }
 0x23e   : > { %1378 = vmatmul.msk.f32.gmra.mxu2 %vm259_vm1, %v492_v23 }
 0x23f   : > { %1411 = vmatmul.msk.f32.gmra.mxu3 %vm259_vm1, %v492_v23 }
 0x241   : > { %v1819_v24 = vpop.f32.mrf.mxu2  ;;  %v1821_v25 = vpop.f32.mrf.mxu3 }
 0x242   : > { %v866_v26 = vmax.f32 %v1819_v24, %v1821_v25 }
 0x244   : > { %867 = vmax.xlane.f32.xlu1 %v866_v26 }
 0x245   : > { %v493_v27 = vpop.trf.xlu0 }
 0x246   : > { %1379 = vmatmul.msk.f32.gmra.mxu2 %vm259_vm1, %v493_v27 }
 0x247   : > { %1412 = vmatmul.msk.f32.gmra.mxu3 %vm259_vm1, %v493_v27 }
 0x249   : > { %v1827_v28 = vpop.f32.mrf.mxu2  ;;  %v1829_v29 = vpop.f32.mrf.mxu3 }
 0x24a   : > { %v869_v30 = vmax.f32 %v1827_v28, %v1829_v29 }
 0x24c   : > { %870 = vmax.xlane.f32.xlu1 %v869_v30 }
 0x251   : > { %v1833_v31 = vpop.f32.mrf.mxu2  ;;  %v1835_v32 = vpop.f32.mrf.mxu3 }
 0x252   : > { %2088 = vst [vmem:[#allocation5_spill] sm:$0xff] %v1833_v31 }
 0x253   : > { %2089 = vst [vmem:[#allocation6_spill] sm:$0xff] %v1835_v32 }
 0x254   : > { %843 = vmax.xlane.f32.xlu1 %v842_v33 }
 0x259   : > { %v1839_v34 = vpop.f32.mrf.mxu2  ;;  %v1841_v35 = vpop.f32.mrf.mxu3 }
 0x25a   : > { %2090 = vst [vmem:[#allocation7_spill] sm:$0xff] %v1839_v34  ;;  %v875_v18 = vmax.f32 %v1839_v34, %v1841_v35 }
 0x25b   : > { %2091 = vst [vmem:[#allocation8_spill] sm:$0xff] %v1841_v35 }
 0x25c   : > { %840 = vmax.xlane.f32.xlu1 %v839_v38 }
 0x261   : > { %v1845_v41 = vpop.f32.mrf.mxu2  ;;  %v1847_v44 = vpop.f32.mrf.mxu3 }
 0x262   : > { %2092 = vst [vmem:[#allocation9_spill] sm:$0xff] %v1845_v41 }
 0x263   : > { %2093 = vst [vmem:[#allocation10_spill] sm:$0xff] %v1847_v44 }
 0x264   : > { %837 = vmax.xlane.f32.xlu1 %v836_v47 }
 0x269   : > { %v1851_v50 = vpop.f32.mrf.mxu2  ;;  %v1853_v53 = vpop.f32.mrf.mxu3 }
 0x26c   : > { %834 = vmax.xlane.f32.xlu1 %v833_v56 }
 0x271   : > { %v1857_v57 = vpop.f32.mrf.mxu2  ;;  %v1859_v58 = vpop.f32.mrf.mxu3 }
 0x274   : > { %831 = vmax.xlane.f32.xlu1 %v830_v61 }
 0x279   : > { %v1863_v62 = vpop.f32.mrf.mxu2  ;;  %v1865_v1 = vpop.f32.mrf.mxu3 }
 0x27a   : > { %v1869_v3 = vpop.xlane.xlu1 %846 }
 0x27c   : > { %828 = vmax.xlane.f32.xlu1 %v827_v2 }
 0x281   : > { %v1871_v6 = vpop.f32.mrf.mxu2  ;;  %v1873_v7 = vpop.f32.mrf.mxu3 }
 0x282   : > { %v1877_v11 = vpop.xlane.xlu1 %849 }
 0x284   : > { %825 = vmax.xlane.f32.xlu1 %v824_v10 }
 0x289   : > { %v1879_v14 = vpop.f32.mrf.mxu2 }
 0x28a   : > { %v1881_v15 = vpop.f32.mrf.mxu3 }
 0x28c   : > { %876 = vmax.xlane.f32.xlu1 %v875_v18 }
 0x28f   : > { %v1885_v19 = vpop.xlane.xlu1 %852 }
 0x291   : > { %v1887_v22 = vpop.f32.mrf.mxu2 }
 0x292   : > { %v1889_v23 = vpop.f32.mrf.mxu3 }
 0x297   : > { %v1895_v30 = vpop.xlane.xlu1 %855 }
 0x299   : > { %v1891_v26 = vpop.f32.mrf.mxu2 }
 0x29a   : > { %2094 = vst [vmem:[#allocation11_spill] sm:$0xff] %v1891_v26  ;;  %v1893_v27 = vpop.f32.mrf.mxu3 }
 0x29b   : > { %2095 = vst [vmem:[#allocation12_spill] sm:$0xff] %v1893_v27  ;;  %v899_v33 = vmax.f32 %v1891_v26, %v1893_v27 }
 0x29d   : > { %900 = vmax.xlane.f32.xlu2 %v899_v33 }
 0x29f   : > { %v1905_v61 = vpop.xlane.xlu1 %858 }
 0x2a1   : > { %v1899_v38 = vpop.f32.mrf.mxu2 }
 0x2a2   : > { %2096 = vst [vmem:[#allocation13_spill] sm:$0xff] %v1899_v38  ;;  %v1901_v47 = vpop.f32.mrf.mxu3 }
 0x2a3   : > { %2097 = vst [vmem:[#allocation14_spill] sm:$0xff] %v1901_v47  ;;  %v902_v56 = vmax.f32 %v1899_v38, %v1901_v47 }
 0x2a5   : > { %903 = vmax.xlane.f32.xlu2 %v902_v56 }
 0x2a7   : > { %v862_v35 = vpop.xlane.xlu1 %861 }
 0x2a9   : > { %v1907_v2 = vpop.f32.mrf.mxu2 }
 0x2aa   : > { %2098 = vst [vmem:[#allocation15_spill] sm:$0xff] %v1907_v2  ;;  %v1909_v10 = vpop.f32.mrf.mxu3 }
 0x2ab   : > { %2099 = vst [vmem:[#allocation16_spill] sm:$0xff] %v1909_v10  ;;  %v905_v18 = vmax.f32 %v1907_v2, %v1909_v10 }
 0x2ad   : > { %906 = vmax.xlane.f32.xlu2 %v905_v18 }
 0x2af   : > { %v865_v32 = vpop.xlane.xlu2 %864 }
 0x2b1   : > { %v1913_v33 = vpop.f32.mrf.mxu2 }
 0x2b2   : > { %2100 = vst [vmem:[#allocation17_spill] sm:$0xff] %v1913_v33  ;;  %v1915_v34 = vpop.f32.mrf.mxu3 }
 0x2b3   : > { %2101 = vst [vmem:[#allocation18_spill] sm:$0xff] %v1915_v34  ;;  %v908_v27 = vmax.f32 %v1913_v33, %v1915_v34 }
 0x2b5   : > { %909 = vmax.xlane.f32.xlu2 %v908_v27 }
 0x2b7   : > { %v868_v26 = vpop.xlane.xlu1 %867 }
 0x2b8   : > { %v948_v18 = vsub.f32 %v1819_v24, %v868_v26  ;;  %v949_v34 = vsub.f32 %v1821_v25, %v868_v26  ;;  %v947_v24 = vsub.f32 %v1813_v21, %v865_v32  ;;  %v944_v25 = vsub.f32 %v1803_v16, %v862_v35 }
 0x2b9   : > { %v1919_v47 = vpop.f32.mrf.mxu2 }
 0x2ba   : > { %2102 = vst [vmem:[#allocation19_spill] sm:$0xff] %v1919_v47  ;;  %v1921_v56 = vpop.f32.mrf.mxu3  ;;  %v1032_v16 = vmul.f32 1.442695, %v944_v25  ;;  %v938_v25 = vsub.f32 %v1781_v5, %v1885_v19  ;;  %v937_v5 = vsub.f32 %v1771_v0, %v1877_v11 }
 0x2bb   : > { %2103 = vst [vmem:[#allocation20_spill] sm:$0xff] %v1921_v56  ;;  %v911_v38 = vmax.f32 %v1919_v47, %v1921_v56  ;;  %v1040_v47 = vmul.f32 1.442695, %v948_v18 }
 0x2bd   : > { %912 = vmax.xlane.f32.xlu2 %v911_v38  ;;  %v946_v38 = vsub.f32 %v1811_v20, %v865_v32  ;;  %v942_v32 = vsub.f32 %v1795_v12, %v1905_v61  ;;  %v941_v12 = vsub.f32 %v1789_v9, %v1895_v30 }
 0x2bf   : > { %v871_v10 = vpop.xlane.xlu1 %870  ;;  %v1036_v26 = vmul.f32 1.442695, %v946_v38  ;;  %v1028_v38 = vmul.f32 1.442695, %v942_v32  ;;  %v893_v32 = vmax.f32 %v1879_v14, %v1881_v15 }
 0x2c0   : > { %v950_v2 = vsub.f32 %v1827_v28, %v871_v10  ;;  %v951_v31 = vsub.f32 %v1829_v29, %v871_v10  ;;  %v1042_v28 = vmul.f32 1.442695, %v949_v34 }
 0x2c1   : > { %v1929_v27 = vpop.f32.mrf.mxu2 }
 0x2c2   : > { %v1044_v33 = vmul.f32 1.442695, %v950_v2  ;;  %v1046_v41 = vmul.f32 1.442695, %v951_v31  ;;  %v1931_v44 = vpop.f32.mrf.mxu3  ;;  %v945_v31 = vsub.f32 %v1805_v17, %v862_v35  ;;  %v1038_v2 = vmul.f32 1.442695, %v947_v24 }
 0x2c3   : > { %v914_v56 = vmax.f32 %v1929_v27, %v1931_v44  ;;  %v943_v17 = vsub.f32 %v1797_v13, %v1905_v61 }
 0x2c4   : > { %1444 = vpow2.f32 %v1044_v33  ;;  %v1034_v34 = vmul.f32 1.442695, %v945_v31  ;;  %v1026_v31 = vmul.f32 1.442695, %v941_v12 }
 0x2c5   : > { %1446 = vpow2.f32 %v1046_v41  ;;  %915 = vmax.xlane.f32.xlu2 %v914_v56  ;;  %v940_v56 = vsub.f32 %v1787_v8, %v1895_v30  ;;  %v1030_v24 = vmul.f32 1.442695, %v943_v17  ;;  %v939_v8 = vsub.f32 %v1779_v4, %v1885_v19 }
 0x2c6   : > { %1448 = vpow2.f32 %v1040_v47 }
 0x2c7   : > { %v1937_v29 = vpop.xlane.xlu1 %843  ;;  %1450 = vpow2.f32 %v1042_v28  ;;  %v896_v28 = vmax.f32 %v1887_v22, %v1889_v23 }
 0x2c8   : > { %1452 = vpow2.f32 %v1036_v26  ;;  %v1024_v26 = vmul.f32 1.442695, %v940_v56  ;;  %v932_v56 = vsub.f32 %v1754_v54, %v1937_v29 }
 0x2c9   : > { %v1941_v10 = vpop.f32.mrf.mxu2  ;;  %1454 = vpow2.f32 %v1038_v2 }
 0x2ca   : > { %v1445_v20 = vpop.eup %1444  ;;  %v1943_v18 = vpop.f32.mrf.mxu3  ;;  %1456 = vpow2.f32 %v1032_v16  ;;  %v934_v16 = vsub.f32 %v1761_v59, %v1869_v3 }
 0x2cb   : > { %v1447_v33 = vpop.eup %1446  ;;  %v917_v21 = vmax.f32 %v1941_v10, %v1943_v18  ;;  %1114 = vmatpush.xpose.msra.mxu0 %v1445_v20  ;;  %1458 = vpow2.f32 %v1034_v34  ;;  %v936_v20 = vsub.f32 %v1769_v63, %v1877_v11  ;;  %v935_v63 = vsub.f32 %v1763_v60, %v1869_v3 }
 0x2cc   : > { %1134 = vmatpush.xpose.msrb.mxu1 %v1447_v33  ;;  %v1449_v35 = vpop.eup %1448  ;;  %1460 = vpow2.f32 %v1028_v38  ;;  %v1020_v33 = vmul.f32 1.442695, %v938_v25  ;;  %v1018_v34 = vmul.f32 1.442695, %v937_v5  ;;  %v933_v38 = vsub.f32 %v1756_v55, %v1937_v29 }
 0x2cd   : > { %918 = vmax.xlane.f32.xlu2 %v917_v21  ;;  %v1451_v41 = vpop.eup %1450  ;;  %1462 = vpow2.f32 %v1030_v24  ;;  %v1022_v21 = vmul.f32 1.442695, %v939_v8  ;;  %v1016_v17 = vmul.f32 1.442695, %v936_v20  ;;  %v1014_v59 = vmul.f32 1.442695, %v935_v63 }
 0x2ce   : > { %v1453_v13 = vpop.eup %1452  ;;  %1464 = vpow2.f32 %v1024_v26  ;;  %v890_v3 = vmax.f32 %v1871_v6, %v1873_v7  ;;  %v1008_v24 = vmul.f32 1.442695, %v932_v56  ;;  %v1010_v54 = vmul.f32 1.442695, %v933_v38 }
 0x2cf   : > { %1115 = vmatpush.xpose.msra.mxu0 %v1449_v35  ;;  %v1951_v47 = vpop.xlane.xlu1 %840  ;;  %v1455_v61 = vpop.eup %1454  ;;  %1466 = vpow2.f32 %v1026_v31 }
 0x2d0   : > { %1135 = vmatpush.xpose.msrb.mxu1 %v1451_v41  ;;  %v1457_v9 = vpop.eup %1456  ;;  %1468 = vpow2.f32 %v1020_v33  ;;  %v1012_v41 = vmul.f32 1.442695, %v934_v16 }
 0x2d1   : > { %v1459_v30 = vpop.eup %1458  ;;  %1470 = vpow2.f32 %v1022_v21 }
 0x2d2   : > { %v1461_v4 = vpop.eup %1460  ;;  %1472 = vpow2.f32 %v1016_v17 }
 0x2d3   : > { %1116 = vmatpush.xpose.msra.mxu0 %v1453_v13  ;;  %v1463_v19 = vpop.eup %1462  ;;  %1474 = vpow2.f32 %v1018_v34  ;;  %v930_v13 = vsub.f32 %v1748_v51, %v1951_v47 }
 0x2d4   : > { %1136 = vmatpush.xpose.msrb.mxu1 %v1455_v61  ;;  %v1465_v0 = vpop.eup %1464  ;;  %1476 = vpow2.f32 %v1012_v41  ;;  %v931_v61 = vsub.f32 %v1750_v52, %v1951_v47  ;;  %v887_v52 = vmax.f32 %v1863_v62, %v1865_v1 }
 0x2d5   : > { %897 = vmax.xlane.f32.xlu2 %v896_v28  ;;  %v1467_v11 = vpop.eup %1466  ;;  %1478 = vpow2.f32 %v1014_v59  ;;  %v1004_v25 = vmul.f32 1.442695, %v930_v13  ;;  %v2105_v13 = vld [vmem:[#allocation9_spill] sm:$0xff] }
 0x2d6   : > { %v1469_v12 = vpop.eup %1468  ;;  %1480 = vpow2.f32 %v1008_v24  ;;  %v1006_v8 = vmul.f32 1.442695, %v931_v61  ;;  %v2104_v24 = vld [vmem:[#allocation10_spill] sm:$0xff] }
 0x2d7   : > { %1117 = vmatpush.xpose.msra.mxu0 %v1457_v9  ;;  %v1963_v2 = vpop.xlane.xlu1 %837  ;;  %v1471_v60 = vpop.eup %1470  ;;  %1482 = vpow2.f32 %v1010_v54  ;;  %v878_v54 = vmax.f32 %v2105_v13, %v2104_v24 }
 0x2d8   : > { %1137 = vmatpush.xpose.msrb.mxu1 %v1459_v30  ;;  %v1473_v28 = vpop.eup %1472  ;;  %v928_v26 = vsub.f32 %v1742_v48, %v1963_v2  ;;  %v929_v51 = vsub.f32 %v1744_v49, %v1963_v2  ;;  %1484 = vpow2.f32 %v1004_v25  ;;  %v2106_v25 = vld [vmem:[#allocation6_spill] sm:$0xff] }
 0x2d9   : > { %v1475_v55 = vpop.eup %1474  ;;  %1486 = vpow2.f32 %v1006_v8 }
 0x2da   : > { %v1477_v31 = vpop.eup %1476  ;;  %v1000_v47 = vmul.f32 1.442695, %v928_v26  ;;  %v1002_v20 = vmul.f32 1.442695, %v929_v51  ;;  %v2107_v26 = vld [vmem:[#allocation5_spill] sm:$0xff] }
 0x2db   : > { %1118 = vmatpush.xpose.msra.mxu0 %v1461_v4  ;;  %v1479_v9 = vpop.eup %1478  ;;  %v872_v8 = vmax.f32 %v2107_v26, %v2106_v25 }
 0x2dc   : > { %1138 = vmatpush.xpose.msrb.mxu1 %v1463_v19  ;;  %v1481_v33 = vpop.eup %1480  ;;  %1488 = vpow2.f32 %v1000_v47 }
 0x2dd   : > { %894 = vmax.xlane.f32.xlu2 %v893_v32  ;;  %v1483_v5 = vpop.eup %1482  ;;  %1490 = vpow2.f32 %v1002_v20 }
 0x2df   : > { %1119 = vmatpush.xpose.msra.mxu0 %v1465_v0  ;;  %v835_v35 = vpop.xlane.xlu1 %834 }
 0x2e0   : > { %1139 = vmatpush.xpose.msrb.mxu1 %v1467_v11  ;;  %v926_v30 = vsub.f32 %v1736_v45, %v835_v35  ;;  %v927_v48 = vsub.f32 %v1738_v46, %v835_v35  ;;  %v1485_v45 = vpop.eup %1484  ;;  %v884_v46 = vmax.f32 %v1857_v57, %v1859_v58 }
 0x2e1   : > { %v1487_v32 = vpop.eup %1486 }
 0x2e2   : > { %v996_v2 = vmul.f32 1.442695, %v926_v30  ;;  %v998_v4 = vmul.f32 1.442695, %v927_v48  ;;  %v1489_v34 = vpop.eup %1488 }
 0x2e3   : > { %1120 = vmatpush.xpose.msra.mxu0 %v1469_v12  ;;  %v1491_v0 = vpop.eup %1490 }
 0x2e4   : > { %1140 = vmatpush.xpose.msrb.mxu1 %v1471_v60  ;;  %1492 = vpow2.f32 %v996_v2 }
 0x2e5   : > { %891 = vmax.xlane.f32.xlu2 %v890_v3  ;;  %1494 = vpow2.f32 %v998_v4  ;;  %v2108_v4 = vld [vmem:[#allocation19_spill] sm:$0xff] }
 0x2e7   : > { %1121 = vmatpush.xpose.msra.mxu0 %v1473_v28  ;;  %v832_v29 = vpop.xlane.xlu1 %831 }
 0x2e8   : > { %1141 = vmatpush.xpose.msrb.mxu1 %v1475_v55  ;;  %v924_v21 = vsub.f32 %v1730_v42, %v832_v29  ;;  %v925_v19 = vsub.f32 %v1732_v43, %v832_v29  ;;  %v2005_v55 = vld [vmem:[#allocation3] sm:$0x1f]  ;;  %v2008_v29 = vld [vmem:[#allocation3 + $0x8] sm:$0x1f] }
 0x2ea   : > { %v992_v16 = vmul.f32 1.442695, %v924_v21  ;;  %v994_v63 = vmul.f32 1.442695, %v925_v19 }
 0x2eb   : > { %1122 = vmatpush.xpose.msra.mxu0 %v1477_v31 }
 0x2ec   : > { %1142 = vmatpush.xpose.msrb.mxu1 %v1479_v9  ;;  %1496 = vpow2.f32 %v992_v16 }
 0x2ed   : > { %888 = vmax.xlane.f32.xlu2 %v887_v52  ;;  %1498 = vpow2.f32 %v994_v63  ;;  %v2110_v63 = vld [vmem:[#allocation17_spill] sm:$0xff] }
 0x2ef   : > { %1123 = vmatpush.xpose.msra.mxu0 %v1481_v33  ;;  %v829_v49 = vpop.xlane.xlu1 %828 }
 0x2f0   : > { %1143 = vmatpush.xpose.msrb.mxu1 %v1483_v5  ;;  %v922_v17 = vsub.f32 %v1724_v39, %v829_v49  ;;  %v923_v42 = vsub.f32 %v1726_v40, %v829_v49  ;;  %v1493_v39 = vpop.eup %1492  ;;  %v881_v40 = vmax.f32 %v1851_v50, %v1853_v53 }
 0x2f1   : > { %v1495_v59 = vpop.eup %1494 }
 0x2f2   : > { %v988_v11 = vmul.f32 1.442695, %v922_v17  ;;  %v990_v41 = vmul.f32 1.442695, %v923_v42  ;;  %v1497_v60 = vpop.eup %1496 }
 0x2f3   : > { %1124 = vmatpush.xpose.msra.mxu0 %v1485_v45  ;;  %v1499_v3 = vpop.eup %1498 }
 0x2f4   : > { %1144 = vmatpush.xpose.msrb.mxu1 %v1487_v32  ;;  %1500 = vpow2.f32 %v988_v11  ;;  %v2109_v32 = vld [vmem:[#allocation20_spill] sm:$0xff] }
 0x2f5   : > { %885 = vmax.xlane.f32.xlu2 %v884_v46  ;;  %1502 = vpow2.f32 %v990_v41  ;;  %v2113_v41 = vld [vmem:[#allocation16_spill] sm:$0xff] }
 0x2f7   : > { %1125 = vmatpush.xpose.msra.mxu0 %v1489_v34  ;;  %v826_v43 = vpop.xlane.xlu1 %825 }
 0x2f8   : > { %1145 = vmatpush.xpose.msrb.mxu1 %v1491_v0  ;;  %v920_v35 = vsub.f32 %v1718_v36, %v826_v43  ;;  %v921_v56 = vsub.f32 %v1720_v37, %v826_v43  ;;  %v2112_v43 = vld [vmem:[#allocation15_spill] sm:$0xff] }
 0x2fa   : > { %v984_v38 = vmul.f32 1.442695, %v920_v35  ;;  %v986_v12 = vmul.f32 1.442695, %v921_v56  ;;  %v1501_v36 = vpop.eup %1500 }
 0x2fb   : > { %1126 = vmatpush.xpose.msra.mxu0 %v1493_v39  ;;  %v1503_v37 = vpop.eup %1502 }
 0x2fc   : > { %1146 = vmatpush.xpose.msrb.mxu1 %v1495_v59  ;;  %1504 = vpow2.f32 %v984_v38 }
 0x2fd   : > { %882 = vmax.xlane.f32.xlu2 %v881_v40  ;;  %1506 = vpow2.f32 %v986_v12  ;;  %v2114_v12 = vld [vmem:[#allocation13_spill] sm:$0xff] }
 0x2ff   : > { %1127 = vmatpush.xpose.msra.mxu0 %v1497_v60 }
 0x300   : > { %1147 = vmatpush.xpose.msrb.mxu1 %v1499_v3 }
 0x302   : > { %v1505_v61 = vpop.eup %1504 }
 0x303   : > { %1128 = vmatpush.xpose.msra.mxu0 %v1501_v36  ;;  %v1507_v28 = vpop.eup %1506  ;;  %v2115_v36 = vld [vmem:[#allocation14_spill] sm:$0xff] }
 0x304   : > { %1148 = vmatpush.xpose.msrb.mxu1 %v1503_v37 }
 0x305   : > { %879 = vmax.xlane.f32.xlu2 %v878_v54 }
 0x307   : > { %1129 = vmatpush.xpose.msra.mxu0 %v1505_v61 }
 0x308   : > { %1149 = vmatpush.xpose.msrb.mxu1 %v1507_v28 }
 0x30a   : > { %1130 = vmatmul.f32.vlgmr.msra.gmra.mxu0 %v2005_v55 }
 0x30b   : > { %1150 = vmatmul.f32.vlgmr.msrb.gmra.mxu1 %v2008_v29 }
 0x30d   : > { %873 = vmax.xlane.f32.xlu2 %v872_v8  ;;  %v2116_v8 = vld [vmem:[#allocation11_spill] sm:$0xff] }
 0x310   : > { %v2013_v51 = vpop.xlane.xlu2 %900 }
 0x318   : > { %v904_v31 = vpop.xlane.xlu2 %903 }
 0x319   : > { %v972_v60 = vsub.f32 %v2114_v12, %v904_v31  ;;  %v973_v37 = vsub.f32 %v2115_v36, %v904_v31 }
 0x320   : > { %v907_v9 = vpop.xlane.xlu2 %906 }
 0x321   : > { %v974_v11 = vsub.f32 %v2112_v43, %v907_v9  ;;  %v975_v56 = vsub.f32 %v2113_v41, %v907_v9  ;;  %v970_v9 = vsub.f32 %v2116_v8, %v2013_v51  ;;  %v2118_v8 = vld [vmem:[#allocation7_spill] sm:$0xff] }
 0x323   : > { %v1092_v3 = vmul.f32 1.442695, %v974_v11  ;;  %v1094_v54 = vmul.f32 1.442695, %v975_v56 }
 0x328   : > { %v910_v52 = vpop.xlane.xlu2 %909 }
 0x329   : > { %v976_v42 = vsub.f32 %v2110_v63, %v910_v52 }
 0x32b   : > { %v1096_v35 = vmul.f32 1.442695, %v976_v42 }
 0x330   : > { %v913_v47 = vpop.xlane.xlu2 %912 }
 0x331   : > { %v978_v19 = vsub.f32 %v2108_v4, %v913_v47  ;;  %v979_v46 = vsub.f32 %v2109_v32, %v913_v47  ;;  %v2117_v47 = vld [vmem:[#allocation12_spill] sm:$0xff] }
 0x338   : > { %v916_v30 = vpop.xlane.xlu2 %915 }
 0x339   : > { %v980_v48 = vsub.f32 %v1929_v27, %v916_v30  ;;  %v981_v49 = vsub.f32 %v1931_v44, %v916_v30  ;;  %v1100_v27 = vmul.f32 1.442695, %v978_v19  ;;  %v971_v30 = vsub.f32 %v2117_v47, %v2013_v51 }
 0x33b   : > { %v1104_v45 = vmul.f32 1.442695, %v980_v48  ;;  %v1106_v16 = vmul.f32 1.442695, %v981_v49 }
 0x340   : > { %v919_v20 = vpop.xlane.xlu2 %918 }
 0x341   : > { %v982_v33 = vsub.f32 %v1941_v10, %v919_v20  ;;  %v983_v5 = vsub.f32 %v1943_v18, %v919_v20  ;;  %v2111_v10 = vld [vmem:[#allocation18_spill] sm:$0xff]  ;;  %v1102_v18 = vmul.f32 1.442695, %v979_v46  ;;  %v1090_v20 = vmul.f32 1.442695, %v973_v37  ;;  %v877_v37 = vpop.xlane.xlu1 %876 }
 0x342   : > { %v977_v34 = vsub.f32 %v2111_v10, %v910_v52  ;;  %v1088_v52 = vmul.f32 1.442695, %v972_v60 }
 0x343   : > { %v1108_v2 = vmul.f32 1.442695, %v982_v33  ;;  %v1110_v21 = vmul.f32 1.442695, %v983_v5  ;;  %v1084_v5 = vmul.f32 1.442695, %v970_v9  ;;  %v954_v9 = vsub.f32 %v2118_v8, %v877_v37 }
 0x344   : > { %v1098_v39 = vmul.f32 1.442695, %v977_v34 }
 0x345   : > { %1508 = vpow2.f32 %v1108_v2  ;;  %v1086_v2 = vmul.f32 1.442695, %v971_v30 }
 0x346   : > { %1510 = vpow2.f32 %v1110_v21 }
 0x347   : > { %1512 = vpow2.f32 %v1104_v45 }
 0x348   : > { %v898_v17 = vpop.xlane.xlu2 %897  ;;  %1514 = vpow2.f32 %v1106_v16 }
 0x349   : > { %1516 = vpow2.f32 %v1100_v27  ;;  %v968_v49 = vsub.f32 %v1887_v22, %v898_v17  ;;  %v969_v21 = vsub.f32 %v1889_v23, %v898_v17 }
 0x34a   : > { %1518 = vpow2.f32 %v1102_v18 }
 0x34b   : > { %v1509_v44 = vpop.eup %1508  ;;  %1520 = vpow2.f32 %v1096_v35  ;;  %v1080_v51 = vmul.f32 1.442695, %v968_v49  ;;  %v1082_v32 = vmul.f32 1.442695, %v969_v21 }
 0x34c   : > { %v1511_v0 = vpop.eup %1510  ;;  %1154 = vmatpush.xpose.msrb.mxu0 %v1509_v44  ;;  %1522 = vpow2.f32 %v1098_v39 }
 0x34d   : > { %1174 = vmatpush.xpose.msra.mxu1 %v1511_v0  ;;  %v1513_v59 = vpop.eup %1512  ;;  %1524 = vpow2.f32 %v1092_v3 }
 0x34e   : > { %v1515_v40 = vpop.eup %1514  ;;  %1526 = vpow2.f32 %v1094_v54 }
 0x34f   : > { %v1517_v61 = vpop.eup %1516  ;;  %1528 = vpow2.f32 %v1088_v52  ;;  %v2119_v52 = vld [vmem:[#allocation8_spill] sm:$0xff] }
 0x350   : > { %1155 = vmatpush.xpose.msrb.mxu0 %v1513_v59  ;;  %v895_v38 = vpop.xlane.xlu2 %894  ;;  %v1519_v28 = vpop.eup %1518  ;;  %1530 = vpow2.f32 %v1090_v20  ;;  %v955_v47 = vsub.f32 %v2119_v52, %v877_v37 }
 0x351   : > { %1175 = vmatpush.xpose.msra.mxu1 %v1515_v40  ;;  %v1521_v48 = vpop.eup %1520  ;;  %1532 = vpow2.f32 %v1084_v5  ;;  %v966_v45 = vsub.f32 %v1879_v14, %v895_v38  ;;  %v967_v46 = vsub.f32 %v1881_v15, %v895_v38 }
 0x352   : > { %v1523_v33 = vpop.eup %1522  ;;  %1534 = vpow2.f32 %v1086_v2  ;;  %v1054_v5 = vmul.f32 1.442695, %v955_v47 }
 0x353   : > { %v1525_v4 = vpop.eup %1524  ;;  %1536 = vpow2.f32 %v1080_v51  ;;  %v1076_v42 = vmul.f32 1.442695, %v966_v45  ;;  %v1078_v17 = vmul.f32 1.442695, %v967_v46 }
 0x354   : > { %1156 = vmatpush.xpose.msrb.mxu0 %v1517_v61  ;;  %v1527_v19 = vpop.eup %1526  ;;  %1538 = vpow2.f32 %v1082_v32 }
 0x355   : > { %1176 = vmatpush.xpose.msra.mxu1 %v1519_v28  ;;  %v1529_v16 = vpop.eup %1528  ;;  %1540 = vpow2.f32 %v1076_v42 }
 0x356   : > { %v1531_v63 = vpop.eup %1530  ;;  %1542 = vpow2.f32 %v1078_v17 }
 0x357   : > { %v1533_v10 = vpop.eup %1532 }
 0x358   : > { %1157 = vmatpush.xpose.msrb.mxu0 %v1521_v48  ;;  %v892_v31 = vpop.xlane.xlu2 %891  ;;  %v1535_v14 = vpop.eup %1534 }
 0x359   : > { %1177 = vmatpush.xpose.msra.mxu1 %v1523_v33  ;;  %v964_v23 = vsub.f32 %v1871_v6, %v892_v31  ;;  %v965_v27 = vsub.f32 %v1873_v7, %v892_v31  ;;  %v1537_v0 = vpop.eup %1536  ;;  %v1052_v31 = vmul.f32 1.442695, %v954_v9 }
 0x35a   : > { %v1539_v43 = vpop.eup %1538 }
 0x35b   : > { %v1072_v34 = vmul.f32 1.442695, %v964_v23  ;;  %v1074_v18 = vmul.f32 1.442695, %v965_v27  ;;  %v1541_v56 = vpop.eup %1540 }
 0x35c   : > { %1158 = vmatpush.xpose.msrb.mxu0 %v1525_v4 }
 0x35d   : > { %1178 = vmatpush.xpose.msra.mxu1 %v1527_v19  ;;  %1544 = vpow2.f32 %v1072_v34 }
 0x35e   : > { %1546 = vpow2.f32 %v1074_v18 }
 0x360   : > { %1159 = vmatpush.xpose.msrb.mxu0 %v1529_v16  ;;  %v889_v22 = vpop.xlane.xlu2 %888 }
 0x361   : > { %1179 = vmatpush.xpose.msra.mxu1 %v1531_v63  ;;  %v962_v15 = vsub.f32 %v1863_v62, %v889_v22  ;;  %v963_v44 = vsub.f32 %v1865_v1, %v889_v22  ;;  %v1543_v62 = vpop.eup %1542 }
 0x363   : > { %v1068_v11 = vmul.f32 1.442695, %v962_v15  ;;  %v1070_v35 = vmul.f32 1.442695, %v963_v44  ;;  %v1545_v59 = vpop.eup %1544 }
 0x364   : > { %1160 = vmatpush.xpose.msrb.mxu0 %v1533_v10  ;;  %v1547_v40 = vpop.eup %1546 }
 0x365   : > { %1180 = vmatpush.xpose.msra.mxu1 %v1535_v14  ;;  %1548 = vpow2.f32 %v1068_v11 }
 0x366   : > { %1550 = vpow2.f32 %v1070_v35 }
 0x368   : > { %1161 = vmatpush.xpose.msrb.mxu0 %v1537_v0  ;;  %v886_v6 = vpop.xlane.xlu2 %885 }
 0x369   : > { %1181 = vmatpush.xpose.msra.mxu1 %v1539_v43  ;;  %v960_v7 = vsub.f32 %v1857_v57, %v886_v6  ;;  %v961_v41 = vsub.f32 %v1859_v58, %v886_v6 }
 0x36b   : > { %v1064_v39 = vmul.f32 1.442695, %v960_v7  ;;  %v1066_v1 = vmul.f32 1.442695, %v961_v41  ;;  %v1549_v58 = vpop.eup %1548 }
 0x36c   : > { %1162 = vmatpush.xpose.msrb.mxu0 %v1541_v56  ;;  %v1551_v36 = vpop.eup %1550 }
 0x36d   : > { %1182 = vmatpush.xpose.msra.mxu1 %v1543_v62  ;;  %1552 = vpow2.f32 %v1064_v39 }
 0x36e   : > { %1554 = vpow2.f32 %v1066_v1 }
 0x370   : > { %1163 = vmatpush.xpose.msrb.mxu0 %v1545_v59  ;;  %v883_v38 = vpop.xlane.xlu2 %882 }
 0x371   : > { %1183 = vmatpush.xpose.msra.mxu1 %v1547_v40  ;;  %v958_v57 = vsub.f32 %v1851_v50, %v883_v38  ;;  %v959_v12 = vsub.f32 %v1853_v53, %v883_v38  ;;  %v1227_v40 = vstv %s1226_s8 }
 0x373   : > { %v1060_v60 = vmul.f32 1.442695, %v958_v57  ;;  %v1062_v3 = vmul.f32 1.442695, %v959_v12  ;;  %v1553_v54 = vpop.eup %1552 }
 0x374   : > { %1164 = vmatpush.xpose.msrb.mxu0 %v1549_v58  ;;  %v1555_v61 = vpop.eup %1554  ;;  %v1232_v57 = vld.sshfl [vmem:[#allocation1 + $0x8] sm:$0xff pattern:$0x75316420] }
 0x375   : > { %1556 = vpow2.f32 %v1060_v60  ;;  %1184 = vmatpush.xpose.msra.mxu1 %v1551_v36  ;;  %v1231_v60 = vld.sshfl [vmem:[#allocation1] sm:$0xff pattern:$0x75316420] }
 0x376   : > { %1558 = vpow2.f32 %v1062_v3 }
 0x378   : > { %1165 = vmatpush.xpose.msrb.mxu0 %v1553_v54  ;;  %v880_v28 = vpop.xlane.xlu2 %879 }
 0x379   : > { %1185 = vmatpush.xpose.msra.mxu1 %v1555_v61  ;;  %v956_v50 = vsub.f32 %v2105_v13, %v880_v28  ;;  %v957_v53 = vsub.f32 %v2104_v24, %v880_v28 }
 0x37b   : > { %v1557_v30 = vpop.eup %1556  ;;  %v1056_v20 = vmul.f32 1.442695, %v956_v50  ;;  %v1058_v48 = vmul.f32 1.442695, %v957_v53 }
 0x37c   : > { %v1559_v33 = vpop.eup %1558  ;;  %1166 = vmatpush.xpose.msrb.mxu0 %v1557_v30 }
 0x37d   : > { %1560 = vpow2.f32 %v1056_v20  ;;  %1186 = vmatpush.xpose.msra.mxu1 %v1559_v33 }
 0x37e   : > { %1562 = vpow2.f32 %v1058_v48 }
 0x37f   : > { %1564 = vpow2.f32 %v1052_v31 }
 0x380   : > { %v874_v49 = vpop.xlane.xlu2 %873  ;;  %1566 = vpow2.f32 %v1054_v5 }
 0x381   : > { %v952_v2 = vsub.f32 %v2107_v26, %v874_v49  ;;  %v953_v13 = vsub.f32 %v2106_v25, %v874_v49 }
 0x383   : > { %v1561_v24 = vpop.eup %1560  ;;  %v1048_v21 = vmul.f32 1.442695, %v952_v2  ;;  %v1050_v4 = vmul.f32 1.442695, %v953_v13 }
 0x384   : > { %v1563_v19 = vpop.eup %1562  ;;  %1167 = vmatpush.xpose.msrb.mxu0 %v1561_v24 }
 0x385   : > { %1568 = vpow2.f32 %v1048_v21  ;;  %1187 = vmatpush.xpose.msra.mxu1 %v1563_v19  ;;  %v1565_v51 = vpop.eup %1564 }
 0x386   : > { %1570 = vpow2.f32 %v1050_v4  ;;  %v1567_v45 = vpop.eup %1566 }
 0x387   : > { %v1131_v25 = vpop.f32.mrf.mxu0 }
 0x388   : > { %1168 = vmatpush.xpose.msrb.mxu0 %v1565_v51  ;;  %v1151_v26 = vpop.f32.mrf.mxu1 }
 0x389   : > { %1188 = vmatpush.xpose.msra.mxu1 %v1567_v45  ;;  %v1152_v16 = vadd.f32 %v1151_v26, %v1131_v25 }
 0x38b   : > { %v1569_v32 = vpop.eup %1568  ;;  %1572 = vrcp.f32 %v1152_v16  ;;  %v1205_v34 = vand.u32 2147483648, %v1152_v16  ;;  %vm1199_vm3 = vweird.f32 %v1152_v16  ;;  %v1203_v15 = vand.u32 2147483647, %v1152_v16 }
 0x38c   : > { %v1571_v46 = vpop.eup %1570  ;;  %1169 = vmatpush.xpose.msrb.mxu0 %v1569_v32 }
 0x38d   : > { %1189 = vmatpush.xpose.msra.mxu1 %v1571_v46  ;;  %v1206_v44 = vor.u32 1.1754944e-38, %v1205_v34  ;;  %vm1204_vm5 = vcmp.eq.f32.partialorder %v1203_v15, 8.507059e+37 }
 0x38f   : > { %1170 = vmatmul.f32.vlgmr.msrb.gmra.mxu0 %v2005_v55 }
 0x390   : > { %1190 = vmatmul.f32.vlgmr.msra.gmra.mxu1 %v2008_v29 }
 0x391   : > { %v1573_v63 = vpop.eup %1572 }
 0x392   : > { %v1195_v22 = vmul.f32 %v1573_v63, %v1152_v16  ;;  %vm1200_vm2 = vweird.f32 %v1573_v63 }
 0x393   : > { %vm1201_vm4 = vmor %vm1199_vm3, %vm1200_vm2 }
 0x394   : > { %v1196_v42 = vsub.f32 1.0, %v1195_v22 }
 0x396   : > { %v1197_v10 = vmul.f32 %v1573_v63, %v1196_v42 }
 0x398   : > { %v1198_v14 = vadd.f32 %v1573_v63, %v1197_v10 }
 0x39a   : > { %v1202_v29 = vsel %vm1201_vm4, %v1573_v63, %v1198_v14 }
 0x39b   : > { %v1207_v43 = vsel %vm1204_vm5, %v1206_v44, %v1202_v29 }
 0x39c   : > { %v1222_v35 = vperm.slane %v1207_v43, 4 }
 0x39e   : > { %v1224_v1 = vmul.f32 %v1222_v35, %v1152_v16 }
 0x3a0   : > { %v1228_v12 = vmul.f32 %v1227_v40, %v1224_v1 }
 0x3a2   : > { %v1235_v36 = vadd.f32 %v1231_v60, %v1228_v12 }
 0x40c   : > { %v1171_v23 = vpop.f32.mrf.mxu0 }
 0x40d   : > { %v1191_v17 = vpop.f32.mrf.mxu1 }
 0x40e   : > { %v1192_v27 = vadd.f32 %v1191_v17, %v1171_v23 }
 0x410   : > { %1574 = vrcp.f32 %v1192_v27  ;;  %v1219_v6 = vand.u32 2147483648, %v1192_v27  ;;  %v1217_v7 = vand.u32 2147483647, %v1192_v27  ;;  %vm1213_vm7 = vweird.f32 %v1192_v27 }
 0x412   : > { %v1220_v56 = vor.u32 1.1754944e-38, %v1219_v6  ;;  %vm1218_vm9 = vcmp.eq.f32.partialorder %v1217_v7, 8.507059e+37 }
 0x416   : > { %v1575_v55 = vpop.eup %1574 }
 0x417   : > { %v1209_v18 = vmul.f32 %v1575_v55, %v1192_v27  ;;  %vm1214_vm6 = vweird.f32 %v1575_v55 }
 0x418   : > { %vm1215_vm8 = vmor %vm1213_vm7, %vm1214_vm6 }
 0x419   : > { %v1210_v0 = vsub.f32 1.0, %v1209_v18 }
 0x41b   : > { %v1211_v11 = vmul.f32 %v1575_v55, %v1210_v0 }
 0x41d   : > { %v1212_v41 = vadd.f32 %v1575_v55, %v1211_v11 }
 0x41f   : > { %v1216_v62 = vsel %vm1215_vm8, %v1575_v55, %v1212_v41 }
 0x420   : > { %v1221_v39 = vsel %vm1218_vm9, %v1220_v56, %v1216_v62 }
 0x421   : > { %v1223_v59 = vperm.slane %v1221_v39, 4 }
 0x423   : > { %v1225_v38 = vmul.f32 %v1223_v59, %v1192_v27 }
 0x425   : > { %v1229_v58 = vmul.f32 %v1227_v40, %v1225_v38 }
 0x427   : > { %v1236_v3 = vadd.f32 %v1232_v57, %v1229_v58 }
 0x429   : > { %v1239_v37 = vrot.slane %v1236_v3, 4 }
 0x42b   : > { %v1240_v54 = vsel %vm263_vm0, %v1235_v36, %v1239_v37 }
 0x42c   : > { %1242 = vst [vmem:[%s247_s11] sm:$0xff] %v1240_v54 }
 0x42d PF: > { %s16_s22 = sadd.s32 1, %s1598_s22   ;;  %s2120_s20 = smov %s1594_s21 }
 0x42e   : > { %p13_p5 = scmp.ge.s32.totalorder %s16_s22, 4   ;;  %s2121_s21 = smov %s2123_s4 }
 0x430   :  { %15 = sbr.rel (!%p13_p5) target bundleno = 2 (0x2), region = 75 }

</bundles_post_ra>
